<compile_context>
chip_gen: v7x
topology: tpu7x:2x2x1
jax: 0.10.0
libtpu: 0.0.40
codegen_flags: <defaults>
</compile_context>

<pallas_src>
import functools

import numpy as np

import jax
import jax.numpy as jnp
from jax.experimental import pallas as pl
from jax.experimental.pallas import tpu as pltpu

EPS = 1e-5


def _in_relu(y, inv_hw):
    """InstanceNorm (biased var, no affine) + ReLU, centered two-pass stats (f32)."""
    mean = jnp.sum(y, axis=-1, keepdims=True) * inv_hw
    c = y - mean
    var = jnp.sum(c * c, axis=-1, keepdims=True) * inv_hw
    return jnp.maximum(c * jax.lax.rsqrt(var + EPS), 0.0)


def _ghost_fused_kernel(x_ref, wp_ref, wd_ref, m_ref, out_ref, *, H, W, C1, C2):
    # x_ref:  (1, Cin, HW)  bf16 input sample (spatial flattened, lane-dense)
    # wp_ref: (C1, Cin)     bf16 1x1 conv weight
    # wd_ref: (C2, 9)       f32 depthwise 3x3 taps for the surviving ghost channels
    # m_ref:  (9, HW)       f32 precomputed 0/1 zero-padding masks, one per tap
    # out_ref:(1, oup, HW)  f32 fused output block (x1 channels then ghost channels)
    HW = H * W
    inv_hw = 1.0 / HW

    # ---- primary 1x1 conv (pointwise matmul on MXU, f32 accumulate) + IN + ReLU --
    x = x_ref[0]                                     # (Cin, HW) bf16
    y1 = jnp.dot(wp_ref[...], x, preferred_element_type=jnp.float32)  # (C1, HW) f32
    x1 = _in_relu(y1, inv_hw)                        # (C1, HW) f32, stays in VMEM

    if C2 > 0:
        # ---- cheap depthwise 3x3 (pad=1) on the first C2 channels of x1 ----
        xg = x1[:C2, :]                              # (C2, HW)
        wd = wd_ref[...]                             # (C2, 9)  loaded once
        masks = m_ref[...]                           # (9, HW)  loaded once

        acc = jnp.zeros((C2, HW), jnp.float32)
        for ki in range(3):
            for kj in range(3):
                di, dj = ki - 1, kj - 1
                off = di * W + dj                    # flat offset of this tap
                kk = ki * 3 + kj
                tap = wd[:, kk:kk + 1]               # (C2, 1) per-channel tap
                if off == 0:
                    acc = acc + tap * xg
                else:
                    # shifted[k] = xg[k + off]; zero-padding via precomputed mask.
                    shifted = pltpu.roll(xg, (-off) % HW, 1)
                    acc = acc + tap * (shifted * masks[kk:kk + 1, :])

        x2 = _in_relu(acc, inv_hw)                   # (C2, HW)
        out = jnp.concatenate([x1, x2], axis=0)      # (oup, HW): fused cat + slice
    else:
        out = x1

    # Single full-tile store (no masked partial store at the C1 sublane boundary).
    out_ref[0, :, :] = out.astype(out_ref.dtype)


def _make_pad_masks(H, W):
    """Trace-time (numpy) 0/1 planes: mask[kk, r*W+c] = 1 iff (r+di, c+dj) in-bounds."""
    rows = np.arange(H)[:, None]
    cols = np.arange(W)[None, :]
    masks = np.zeros((9, H * W), np.float32)
    for ki in range(3):
        for kj in range(3):
            di, dj = ki - 1, kj - 1
            ok = ((rows + di >= 0) & (rows + di <= H - 1) &
                  (cols + dj >= 0) & (cols + dj <= W - 1))
            masks[ki * 3 + kj] = ok.astype(np.float32).reshape(-1)
    return jnp.asarray(masks)


def ghost_module_forward(x, w_primary, w_dw, oup):
    """x: (N, Cin, H, W) f32; w_primary: (C1, Cin); w_dw: (C1, 3, 3)."""
    N, Cin, H, W = x.shape
    C1 = w_primary.shape[0]
    C2 = oup - C1                       # ghost channels that survive [:, :oup]
    assert 0 <= C2 <= C1, f"GhostModule expects 0 <= oup - C1 <= C1, got C1={C1}, oup={oup}"
    HW = H * W

    # bf16 MXU operands (f32 accumulate inside the kernel); halves input DMA traffic.
    x_flat = x.reshape(N, Cin, HW).astype(jnp.bfloat16)
    wp = w_primary.astype(jnp.bfloat16)
    if C2 > 0:
        wd = w_dw[:C2].reshape(C2, 9).astype(jnp.float32)
    else:
        wd = jnp.zeros((1, 9), jnp.float32)          # dummy (unused when C2 == 0)
    wd_rows = wd.shape[0]
    masks = _make_pad_masks(H, W)                    # (9, HW) f32, compile-time constants

    # Advisory cost model: 1x1 matmul + 9-tap depthwise + IN, per sample.
    flops = N * (2 * C1 * Cin * HW + 3 * 9 * C2 * HW + 5 * (C1 + C2) * HW)
    bytes_accessed = (x_flat.size * 2 + wp.size * 2 + wd.size * 4 +
                      masks.size * 4 + N * oup * HW * 4)
    cost = pl.CostEstimate(flops=flops, transcendentals=N * (C1 + C2),
                           bytes_accessed=bytes_accessed)

    out_flat = pl.pallas_call(
        functools.partial(_ghost_fused_kernel, H=H, W=W, C1=C1, C2=C2),
        out_shape=jax.ShapeDtypeStruct((N, oup, HW), jnp.float32),
        grid=(N,),
        in_specs=[
            pl.BlockSpec((1, Cin, HW), lambda n: (n, 0, 0)),
            pl.BlockSpec((C1, Cin), lambda n: (0, 0)),
            pl.BlockSpec((wd_rows, 9), lambda n: (0, 0)),
            pl.BlockSpec((9, HW), lambda n: (0, 0)),
        ],
        out_specs=pl.BlockSpec((1, oup, HW), lambda n: (n, 0, 0)),
        compiler_params=pltpu.CompilerParams(
            dimension_semantics=("parallel",),
            vmem_limit_bytes=32 * 1024 * 1024),
        cost_estimate=cost,
    )(x_flat, wp, wd, masks)

    return out_flat.reshape(N, oup, H, W)


# ---------------------------------------------------------------------------
# Pure-JAX reference for a sanity check.
# ---------------------------------------------------------------------------
def _ref_forward(x, w_primary, w_dw, oup):
    C1 = w_primary.shape[0]

    def inorm(z):
        m = z.mean(axis=(2, 3), keepdims=True)
        v = ((z - m) ** 2).mean(axis=(2, 3), keepdims=True)
        return (z - m) / jnp.sqrt(v + EPS)

    y1 = jax.lax.conv_general_dilated(
        x, w_primary[:, :, None, None], (1, 1), "VALID",
        dimension_numbers=("NCHW", "OIHW", "NCHW"))
    x1 = jax.nn.relu(inorm(y1))
    y2 = jax.lax.conv_general_dilated(
        x1, w_dw[:, None, :, :], (1, 1), ((1, 1), (1, 1)),
        dimension_numbers=("NCHW", "OIHW", "NCHW"),
        feature_group_count=C1)
    x2 = jax.nn.relu(inorm(y2))
    return jnp.concatenate([x1, x2], axis=1)[:, :oup, :, :]


if __name__ == "__main__":
    # Module hyper-params (kernel=(1,1), dw_kernel=3, act=True)
    N, Cin, H, W = 2, 4, 16, 16
    oup = 7
    C1 = (oup + 1) // 2  # init_channels = 4

    key = jax.random.PRNGKey(0)
    kx, kw1, kw2 = jax.random.split(key, 3)
    x = jax.random.normal(kx, (N, Cin, H, W), dtype=jnp.float32)
    # Deterministic, Kaiming-ish scaled weights (Conv2d, bias=False).
    w_primary = jax.random.normal(kw1, (C1, Cin), dtype=jnp.float32) * (1.0 / Cin) ** 0.5
    w_dw = jax.random.normal(kw2, (C1, 3, 3), dtype=jnp.float32) * (1.0 / 9.0) ** 0.5

    out = jax.jit(ghost_module_forward, static_argnums=3)(x, w_primary, w_dw, oup)
    out = jax.block_until_ready(out)

    assert out.shape == (N, oup, H, W), out.shape

    ref = _ref_forward(x, w_primary, w_dw, oup)
    max_diff = float(jnp.max(jnp.abs(out - ref)))
    # Tolerance admits the explicit bf16 MXU operands (same passes the default
    # f32 TPU dot would take anyway).
    assert max_diff < 5e-2, f"max diff too large: {max_diff}"

    print("KERNEL_OK")
</pallas_src>

<mosaic_0001>
module attributes {stable_mosaic.version = 11 : i64} {
  func.func @_ghost_fused_kernel(%arg0: i32, %arg1: memref<1x4x256xbf16, #tpu.memory_space<vmem>>, %arg2: memref<4x4xbf16, #tpu.memory_space<vmem>>, %arg3: memref<3x9xf32, #tpu.memory_space<vmem>>, %arg4: memref<9x256xf32, #tpu.memory_space<vmem>>, %arg5: memref<1x7x256xf32, #tpu.memory_space<vmem>>) attributes {dimension_semantics = [#tpu.dimension_semantics<parallel>], iteration_bounds = array<i64: 2>, scalar_prefetch = 0 : i64, scratch_operands = 0 : i64, tpu.core_type = #tpu.core_type<tc>, window_params = [{transform_indices = @transform_0, window_bounds = array<i64: 1, 4, 256>}, {pipeline_mode = #tpu.pipeline_mode<synchronous>, transform_indices = @transform_1, window_bounds = array<i64: 4, 4>}, {pipeline_mode = #tpu.pipeline_mode<synchronous>, transform_indices = @transform_2, window_bounds = array<i64: 3, 9>}, {pipeline_mode = #tpu.pipeline_mode<synchronous>, transform_indices = @transform_3, window_bounds = array<i64: 9, 256>}, {transform_indices = @transform_4, window_bounds = array<i64: 1, 7, 256>}]} {
    %c0 = arith.constant 0 : index
    %c0_0 = arith.constant 0 : index
    %c0_1 = arith.constant 0 : index
    %0 = vector.load %arg1[%c0, %c0_0, %c0_1] : memref<1x4x256xbf16, #tpu.memory_space<vmem>>, vector<1x4x256xbf16>
    %1 = vector.shape_cast %0 : vector<1x4x256xbf16> to vector<4x256xbf16>
    %c0_2 = arith.constant 0 : index
    %c0_3 = arith.constant 0 : index
    %2 = vector.load %arg2[%c0_2, %c0_3] : memref<4x4xbf16, #tpu.memory_space<vmem>>, vector<4x4xbf16>
    %cst = arith.constant dense<0.000000e+00> : vector<4x256xf32>
    %3 = tpu.matmul %2, %1, %cst {dimension_numbers = #tpu.dot_dimension_numbers<[1], [0], [0], [1], [0, 0, 1, 1], [], []>} : vector<4x4xbf16>, vector<4x256xbf16>, vector<4x256xf32> -> vector<4x256xf32>
    %cst_4 = arith.constant dense<0.000000e+00> : vector<4xf32>
    %4 = vector.multi_reduction <add>, %3, %cst_4 [1] : vector<4x256xf32> to vector<4xf32>
    %5 = vector.shape_cast %4 : vector<4xf32> to vector<4x1xf32>
    %cst_5 = arith.constant 3.906250e-03 : f32
    %6 = vector.broadcast %cst_5 : f32 to vector<4x1xf32>
    %7 = arith.mulf %5, %6 : vector<4x1xf32>
    %8 = vector.broadcast %7 : vector<4x1xf32> to vector<4x256xf32>
    %9 = arith.subf %3, %8 : vector<4x256xf32>
    %10 = arith.mulf %9, %9 : vector<4x256xf32>
    %cst_6 = arith.constant dense<0.000000e+00> : vector<4xf32>
    %11 = vector.multi_reduction <add>, %10, %cst_6 [1] : vector<4x256xf32> to vector<4xf32>
    %12 = vector.shape_cast %11 : vector<4xf32> to vector<4x1xf32>
    %cst_7 = arith.constant 3.906250e-03 : f32
    %13 = vector.broadcast %cst_7 : f32 to vector<4x1xf32>
    %14 = arith.mulf %12, %13 : vector<4x1xf32>
    %cst_8 = arith.constant 9.99999974E-6 : f32
    %15 = vector.broadcast %cst_8 : f32 to vector<4x1xf32>
    %16 = arith.addf %14, %15 : vector<4x1xf32>
    %17 = math.rsqrt %16 : vector<4x1xf32>
    %18 = vector.broadcast %17 : vector<4x1xf32> to vector<4x256xf32>
    %19 = arith.mulf %9, %18 : vector<4x256xf32>
    %cst_9 = arith.constant 0.000000e+00 : f32
    %20 = vector.broadcast %cst_9 : f32 to vector<4x256xf32>
    %21 = arith.maximumf %19, %20 : vector<4x256xf32>
    %22 = vector.extract_strided_slice %21 {offsets = [0, 0], sizes = [3, 256], strides = [1, 1]} : vector<4x256xf32> to vector<3x256xf32>
    %c0_10 = arith.constant 0 : index
    %c0_11 = arith.constant 0 : index
    %23 = vector.load %arg3[%c0_10, %c0_11] : memref<3x9xf32, #tpu.memory_space<vmem>>, vector<3x9xf32>
    %c0_12 = arith.constant 0 : index
    %c0_13 = arith.constant 0 : index
    %24 = vector.load %arg4[%c0_12, %c0_13] : memref<9x256xf32, #tpu.memory_space<vmem>>, vector<9x256xf32>
    %cst_14 = arith.constant 0.000000e+00 : f32
    %25 = vector.broadcast %cst_14 : f32 to vector<3x256xf32>
    %26 = vector.extract_strided_slice %23 {offsets = [0, 0], sizes = [3, 1], strides = [1, 1]} : vector<3x9xf32> to vector<3x1xf32>
    %c17_i32 = arith.constant 17 : i32
    %27 = tpu.dynamic_rotate %22 by %c17_i32 dim 1 : vector<3x256xf32>, i32 -> vector<3x256xf32>
    %28 = vector.extract_strided_slice %24 {offsets = [0, 0], sizes = [1, 256], strides = [1, 1]} : vector<9x256xf32> to vector<1x256xf32>
    %29 = vector.broadcast %28 : vector<1x256xf32> to vector<3x256xf32>
    %30 = arith.mulf %27, %29 : vector<3x256xf32>
    %31 = vector.broadcast %26 : vector<3x1xf32> to vector<3x256xf32>
    %32 = arith.mulf %31, %30 : vector<3x256xf32>
    %33 = arith.addf %25, %32 : vector<3x256xf32>
    %34 = vector.extract_strided_slice %23 {offsets = [0, 1], sizes = [3, 1], strides = [1, 1]} : vector<3x9xf32> to vector<3x1xf32>
    %c16_i32 = arith.constant 16 : i32
    %35 = tpu.dynamic_rotate %22 by %c16_i32 dim 1 : vector<3x256xf32>, i32 -> vector<3x256xf32>
    %36 = vector.extract_strided_slice %24 {offsets = [1, 0], sizes = [1, 256], strides = [1, 1]} : vector<9x256xf32> to vector<1x256xf32>
    %37 = vector.broadcast %36 : vector<1x256xf32> to vector<3x256xf32>
    %38 = arith.mulf %35, %37 : vector<3x256xf32>
    %39 = vector.broadcast %34 : vector<3x1xf32> to vector<3x256xf32>
    %40 = arith.mulf %39, %38 : vector<3x256xf32>
    %41 = arith.addf %33, %40 : vector<3x256xf32>
    %42 = vector.extract_strided_slice %23 {offsets = [0, 2], sizes = [3, 1], strides = [1, 1]} : vector<3x9xf32> to vector<3x1xf32>
    %c15_i32 = arith.constant 15 : i32
    %43 = tpu.dynamic_rotate %22 by %c15_i32 dim 1 : vector<3x256xf32>, i32 -> vector<3x256xf32>
    %44 = vector.extract_strided_slice %24 {offsets = [2, 0], sizes = [1, 256], strides = [1, 1]} : vector<9x256xf32> to vector<1x256xf32>
    %45 = vector.broadcast %44 : vector<1x256xf32> to vector<3x256xf32>
    %46 = arith.mulf %43, %45 : vector<3x256xf32>
    %47 = vector.broadcast %42 : vector<3x1xf32> to vector<3x256xf32>
    %48 = arith.mulf %47, %46 : vector<3x256xf32>
    %49 = arith.addf %41, %48 : vector<3x256xf32>
    %50 = vector.extract_strided_slice %23 {offsets = [0, 3], sizes = [3, 1], strides = [1, 1]} : vector<3x9xf32> to vector<3x1xf32>
    %c1_i32 = arith.constant 1 : i32
    %51 = tpu.dynamic_rotate %22 by %c1_i32 dim 1 : vector<3x256xf32>, i32 -> vector<3x256xf32>
    %52 = vector.extract_strided_slice %24 {offsets = [3, 0], sizes = [1, 256], strides = [1, 1]} : vector<9x256xf32> to vector<1x256xf32>
    %53 = vector.broadcast %52 : vector<1x256xf32> to vector<3x256xf32>
    %54 = arith.mulf %51, %53 : vector<3x256xf32>
    %55 = vector.broadcast %50 : vector<3x1xf32> to vector<3x256xf32>
    %56 = arith.mulf %55, %54 : vector<3x256xf32>
    %57 = arith.addf %49, %56 : vector<3x256xf32>
    %58 = vector.extract_strided_slice %23 {offsets = [0, 4], sizes = [3, 1], strides = [1, 1]} : vector<3x9xf32> to vector<3x1xf32>
    %59 = vector.broadcast %58 : vector<3x1xf32> to vector<3x256xf32>
    %60 = arith.mulf %59, %22 : vector<3x256xf32>
    %61 = arith.addf %57, %60 : vector<3x256xf32>
    %62 = vector.extract_strided_slice %23 {offsets = [0, 5], sizes = [3, 1], strides = [1, 1]} : vector<3x9xf32> to vector<3x1xf32>
    %c255_i32 = arith.constant 255 : i32
    %63 = tpu.dynamic_rotate %22 by %c255_i32 dim 1 : vector<3x256xf32>, i32 -> vector<3x256xf32>
    %64 = vector.extract_strided_slice %24 {offsets = [5, 0], sizes = [1, 256], strides = [1, 1]} : vector<9x256xf32> to vector<1x256xf32>
    %65 = vector.broadcast %64 : vector<1x256xf32> to vector<3x256xf32>
    %66 = arith.mulf %63, %65 : vector<3x256xf32>
    %67 = vector.broadcast %62 : vector<3x1xf32> to vector<3x256xf32>
    %68 = arith.mulf %67, %66 : vector<3x256xf32>
    %69 = arith.addf %61, %68 : vector<3x256xf32>
    %70 = vector.extract_strided_slice %23 {offsets = [0, 6], sizes = [3, 1], strides = [1, 1]} : vector<3x9xf32> to vector<3x1xf32>
    %c241_i32 = arith.constant 241 : i32
    %71 = tpu.dynamic_rotate %22 by %c241_i32 dim 1 : vector<3x256xf32>, i32 -> vector<3x256xf32>
    %72 = vector.extract_strided_slice %24 {offsets = [6, 0], sizes = [1, 256], strides = [1, 1]} : vector<9x256xf32> to vector<1x256xf32>
    %73 = vector.broadcast %72 : vector<1x256xf32> to vector<3x256xf32>
    %74 = arith.mulf %71, %73 : vector<3x256xf32>
    %75 = vector.broadcast %70 : vector<3x1xf32> to vector<3x256xf32>
    %76 = arith.mulf %75, %74 : vector<3x256xf32>
    %77 = arith.addf %69, %76 : vector<3x256xf32>
    %78 = vector.extract_strided_slice %23 {offsets = [0, 7], sizes = [3, 1], strides = [1, 1]} : vector<3x9xf32> to vector<3x1xf32>
    %c240_i32 = arith.constant 240 : i32
    %79 = tpu.dynamic_rotate %22 by %c240_i32 dim 1 : vector<3x256xf32>, i32 -> vector<3x256xf32>
    %80 = vector.extract_strided_slice %24 {offsets = [7, 0], sizes = [1, 256], strides = [1, 1]} : vector<9x256xf32> to vector<1x256xf32>
    %81 = vector.broadcast %80 : vector<1x256xf32> to vector<3x256xf32>
    %82 = arith.mulf %79, %81 : vector<3x256xf32>
    %83 = vector.broadcast %78 : vector<3x1xf32> to vector<3x256xf32>
    %84 = arith.mulf %83, %82 : vector<3x256xf32>
    %85 = arith.addf %77, %84 : vector<3x256xf32>
    %86 = vector.extract_strided_slice %23 {offsets = [0, 8], sizes = [3, 1], strides = [1, 1]} : vector<3x9xf32> to vector<3x1xf32>
    %c239_i32 = arith.constant 239 : i32
    %87 = tpu.dynamic_rotate %22 by %c239_i32 dim 1 : vector<3x256xf32>, i32 -> vector<3x256xf32>
    %88 = vector.extract_strided_slice %24 {offsets = [8, 0], sizes = [1, 256], strides = [1, 1]} : vector<9x256xf32> to vector<1x256xf32>
    %89 = vector.broadcast %88 : vector<1x256xf32> to vector<3x256xf32>
    %90 = arith.mulf %87, %89 : vector<3x256xf32>
    %91 = vector.broadcast %86 : vector<3x1xf32> to vector<3x256xf32>
    %92 = arith.mulf %91, %90 : vector<3x256xf32>
    %93 = arith.addf %85, %92 : vector<3x256xf32>
    %cst_15 = arith.constant dense<0.000000e+00> : vector<3xf32>
    %94 = vector.multi_reduction <add>, %93, %cst_15 [1] : vector<3x256xf32> to vector<3xf32>
    %95 = vector.shape_cast %94 : vector<3xf32> to vector<3x1xf32>
    %cst_16 = arith.constant 3.906250e-03 : f32
    %96 = vector.broadcast %cst_16 : f32 to vector<3x1xf32>
    %97 = arith.mulf %95, %96 : vector<3x1xf32>
    %98 = vector.broadcast %97 : vector<3x1xf32> to vector<3x256xf32>
    %99 = arith.subf %93, %98 : vector<3x256xf32>
    %100 = arith.mulf %99, %99 : vector<3x256xf32>
    %cst_17 = arith.constant dense<0.000000e+00> : vector<3xf32>
    %101 = vector.multi_reduction <add>, %100, %cst_17 [1] : vector<3x256xf32> to vector<3xf32>
    %102 = vector.shape_cast %101 : vector<3xf32> to vector<3x1xf32>
    %cst_18 = arith.constant 3.906250e-03 : f32
    %103 = vector.broadcast %cst_18 : f32 to vector<3x1xf32>
    %104 = arith.mulf %102, %103 : vector<3x1xf32>
    %cst_19 = arith.constant 9.99999974E-6 : f32
    %105 = vector.broadcast %cst_19 : f32 to vector<3x1xf32>
    %106 = arith.addf %104, %105 : vector<3x1xf32>
    %107 = math.rsqrt %106 : vector<3x1xf32>
    %108 = vector.broadcast %107 : vector<3x1xf32> to vector<3x256xf32>
    %109 = arith.mulf %99, %108 : vector<3x256xf32>
    %cst_20 = arith.constant 0.000000e+00 : f32
    %110 = vector.broadcast %cst_20 : f32 to vector<3x256xf32>
    %111 = arith.maximumf %109, %110 : vector<3x256xf32>
    %112 = tpu.concatenate %21, %111 in 0 : vector<4x256xf32>, vector<3x256xf32> -> vector<7x256xf32>
    %c0_21 = arith.constant 0 : index
    %c0_22 = arith.constant 0 : index
    %c0_23 = arith.constant 0 : index
    %113 = vector.load %arg5[%c0_21, %c0_22, %c0_23] : memref<1x7x256xf32, #tpu.memory_space<vmem>>, vector<1x7x256xf32>
    %114 = vector.shape_cast %113 : vector<1x7x256xf32> to vector<7x256xf32>
    %115 = vector.shape_cast %112 : vector<7x256xf32> to vector<1x7x256xf32>
    tpu.vector_store %arg5[%c0_21, %c0_22, %c0_23], %115 {strides = array<i32>} : memref<1x7x256xf32, #tpu.memory_space<vmem>>, vector<1x7x256xf32>,
    return
  }
  func.func @transform_0(%arg0: i32) -> (i32, i32, i32) {
    %c0_i32 = arith.constant 0 : i32
    %c0_i32_0 = arith.constant 0 : i32
    %c0_i32_1 = arith.constant 0 : i32
    return %arg0, %c0_i32, %c0_i32_0 : i32, i32, i32
  }
  func.func @transform_1(%arg0: i32) -> (i32, i32) {
    %c0_i32 = arith.constant 0 : i32
    %c0_i32_0 = arith.constant 0 : i32
    %c0_i32_1 = arith.constant 0 : i32
    return %c0_i32, %c0_i32_0 : i32, i32
  }
  func.func @transform_2(%arg0: i32) -> (i32, i32) {
    %c0_i32 = arith.constant 0 : i32
    %c0_i32_0 = arith.constant 0 : i32
    %c0_i32_1 = arith.constant 0 : i32
    return %c0_i32, %c0_i32_0 : i32, i32
  }
  func.func @transform_3(%arg0: i32) -> (i32, i32) {
    %c0_i32 = arith.constant 0 : i32
    %c0_i32_0 = arith.constant 0 : i32
    %c0_i32_1 = arith.constant 0 : i32
    return %c0_i32, %c0_i32_0 : i32, i32
  }
  func.func @transform_4(%arg0: i32) -> (i32, i32, i32) {
    %c0_i32 = arith.constant 0 : i32
    %c0_i32_0 = arith.constant 0 : i32
    %c0_i32_1 = arith.constant 0 : i32
    return %arg0, %c0_i32, %c0_i32_0 : i32, i32, i32
  }
}

</mosaic_0001>

<bundles_post_ra>
// kernel: ghost_module_forward.1
= control target key start
LH: loop header
LB: loop body
LE: loop exit
PB: predicated region body
PF: predicated region fallthrough
CT: control target
= control target key end

     0   :  { %s695_s15 = smov 0   ;;  %s817_s0 = inlined_call_operand.vmem [shape: bf16[2,4,256], index: 0, kind: input, shape index: {}]   ;;  %s818_s1 = inlined_call_operand.vmem [shape: bf16[4,4], index: 1, kind: input, shape index: {}]   ;;  %s819_s2 = inlined_call_operand.vmem [shape: f32[3,9], index: 2, kind: input, shape index: {}]   ;;  %s820_s3 = inlined_call_operand.vmem [shape: f32[9,256], index: 3, kind: input, shape index: {}]   ;;  %s821_s4 = inlined_call_operand.vmem [shape: f32[2,7,256], index: 4, kind: output, shape index: {}]  }
   0x1 LB: > { %s589_s16 = sadd.s32 4294967295, %s651_s15   ;;  %p593_p0 = scmp.ge.s32.totalorder %s651_s15, 1  ;;  %s651_s15 = sphi %s695_s15, %s14_s15  }
   0x2   : > { %p162_p1 = scmp.lt.s32.totalorder %s651_s15, 3 }
   0x4   : > { %p163_p2 = pnand %p593_p0, %p162_p1 }
   0x5   : > { %p188_p3 = scmp.lt.s32.totalorder (!%p163_p2), %s589_s16, 1  ;;  %v653_v0 = vmov (!%p163_p2), 0   ;;  %vm214_vm0 = vcmask (!%p163_p2), 1041408   ;;  %v200_v4 = vld [vmem:[%s818_s1] sm:$0x3] (!%p163_p2)  ;;  %vm210_vm1 = vcmask (!%p163_p2), 31744   ;;  %v294_v49 = vlaneseq (!%p163_p2) }
   0x6   : > { %166 = sbr.rel (%p163_p2) target bundleno = 1048 (0x418), region = 36  ;;  %253 = vmatprep.mubr.bf16.mxu0 (!%p163_p2), %v653_v0  ;;  %632 = vset.pattern.permute.xlu1 (!%p163_p2), %v653_v0  ;;  %vm262_vm2 = vcmask (!%p163_p2), 1043456   ;;  %v285_v12 = vld [vmem:[%s819_s2] sm:$0x7] (!%p163_p2)  ;;  %v654_v13 = vmov (!%p163_p2), 2   ;;  %v655_v14 = vmov (!%p163_p2), 1  }
   0x7   : > { %311 = vperm.xlu1 (!%p163_p2), %632, %v285_v12   ;;  %634 = vset.pattern.permute.xlu0 (!%p163_p2), %v654_v13  ;;  %v656_v15 = vmov (!%p163_p2), 3   ;;  %v657_v16 = vmov (!%p163_p2), 4   ;;  %v658_v26 = vmov (!%p163_p2), 5   ;;  %v659_v27 = vmov (!%p163_p2), 6   ;;  %s662_s25 = smov (!%p163_p2), 111   ;;  %s663_s26 = smov (!%p163_p2), 17  }
   0x8   : > { %v660_v28 = vmov (!%p163_p2), 7   ;;  %v661_v29 = vmov (!%p163_p2), 8   ;;  %s664_s27 = smov (!%p163_p2), 16   ;;  %s665_s28 = smov (!%p163_p2), 15   ;;  %v745_v51 = vshrl.u32 (!%p163_p2), %v294_v49, 7  ;;  %v747_v52 = vand.u32 (!%p163_p2), 127, %v294_v49 }
   0x9   : > { %s666_s29 = smov (!%p163_p2), 1   ;;  %s667_s30 = smov (!%p163_p2), 127   ;;  %v756_v57 = vld [vmem:[%s820_s3] sm:$0xff] (!%p163_p2)  ;;  %v761_v58 = vld [vmem:[%s820_s3 + $0x8] sm:$0xff] (!%p163_p2)  ;;  %vm501_vm11 = vcmask (!%p163_p2), 1042432  }
   0xa   : > { %s668_s5 = smov (!%p163_p2), 113   ;;  %s669_s6 = smov (!%p163_p2), 112   ;;  %v327_v53 = vsub.s32 (!%p163_p2), 1, %v745_v51  ;;  %v301_v55 = vsub.s32 (!%p163_p2), 0, %v745_v51  ;;  %vm322_vm3 = vcmp.lt.s32.totalorder (!%p163_p2), %v747_v52, 16  ;;  %v352_v56 = vsub.s32 (!%p163_p2), 2, %v745_v51 }
   0xb   : > { %633 = vset.pattern.permute.xlu1 (!%p163_p2), %v655_v14  ;;  %vm296_vm4 = vcmp.lt.s32.totalorder (!%p163_p2), %v747_v52, 17  ;;  %vm347_vm5 = vcmp.lt.s32.totalorder (!%p163_p2), %v747_v52, 15  ;;  %vm372_vm6 = vcmp.lt.s32.totalorder (!%p163_p2), %v747_v52, 1  ;;  %vm405_vm7 = vcmp.lt.s32.totalorder (!%p163_p2), %v747_v52, 127 }
   0xc   : > { %336 = vperm.xlu1 (!%p163_p2), %633, %v285_v12   ;;  %v328_v60 = vrot.slane (!%p163_p2), %v756_v57, %v327_v53  ;;  %v332_v61 = vrot.slane (!%p163_p2), %v761_v58, %v327_v53  ;;  %vm430_vm8 = vcmp.lt.s32.totalorder (!%p163_p2), %v747_v52, 113  ;;  %vm455_vm9 = vcmp.lt.s32.totalorder (!%p163_p2), %v747_v52, 112 }
   0xd   : > { %s823_s16 = smov (!%p188_p3, %s589_s16), 1  ;;  %vm480_vm10 = vcmp.lt.s32.totalorder %v747_v52, 111 }
   0xe   : > { %s605_s17 = sshll.u32 %s823_s16, 2 }
   0xf   : > { %s192_s20 = scalar_lea.vmem %s817_s0, %s605_s17  ;;  %s606_s17 = sshll.u32 %s823_s16, 4 }
  0x10   : > { %v598_v1 = vld.sshfl [vmem:[%s192_s20] sm:$0x33 pattern:$0x76325410]  ;;  %635 = vset.pattern.permute.xlu1 %v656_v15  ;;  %s197_s20 = scalar_lea.vmem %s821_s4, %s606_s17 }
  0x11   : > { %v209_v2 = vcombine.high %v598_v1, %v598_v1  ;;  %v216_v3 = vsel %vm214_vm0, %v598_v1, 0  ;;  %386 = vperm.xlu1 %635, %v285_v12   ;;  %v377_v1 = vsub.s32 3, %v745_v51 }
  0x13   : > { %599 = vmatprep.subr.msk.bf16.mxu0 %vm214_vm0, %v209_v2  ;;  %v302_v2 = vrot.slane %v756_v57, %v301_v55  ;;  %v378_v13 = vrot.slane %v756_v57, %v377_v1  ;;  %v382_v14 = vrot.slane %v761_v58, %v377_v1 }
  0x14   : > { %222 = vmatpush1.bf16.msra.mxu0 %v216_v3  ;;  %v306_v3 = vrot.slane %v761_v58, %v301_v55 }
  0x15   : > { %636 = vset.pattern.permute.xlu1 %v657_v16 }
  0x16   : > { %394 = vperm.xlu1 %636, %v285_v12  }
  0x17   : > { %600 = vmatmul.mubr.msk.bf16.vlgmr.msra.gmra.mrb[0].mxu0 %vm210_vm1, %v200_v4  ;;  %v353_v4 = vrot.slane %v756_v57, %v352_v56 }
  0x1a   : > { %637 = vset.pattern.permute.xlu1 %v658_v26 }
  0x1b   : > { %419 = vperm.xlu1 %637, %v285_v12  }
  0x86   : > { %v312_v38 = vpop.permute.xlu1 %311 }
  0x8b   : > { %v337_v39 = vpop.permute.xlu1 %336 }
  0x90   : > { %v739_v40 = vpop.permute.xlu1 %386 }
  0x95   : > { %v741_v41 = vpop.permute.xlu1 %394 }
  0x9a   : > { %v743_v42 = vpop.permute.xlu1 %419 }
  0xea   : > { %v255_v5 = vpop.f32.mrb[0].mxu0 }
  0xeb   : > { %v257_v6 = vpop.f32.mrb[1].mxu0  ;;  %v263_v7 = vsel %vm262_vm2, %v255_v5, 0.0 }
  0xec   : > { %v259_v8 = vpop.f32.mrb[2].mxu0  ;;  %v264_v9 = vsel %vm262_vm2, %v257_v6, 0.0 }
  0xed   : > { %v260_v10 = vpop.f32.mrb[3].mxu0  ;;  %v265_v11 = vadd.f32 %v264_v9, %v263_v7  ;;  %v357_v7 = vrot.slane %v761_v58, %v352_v56 }
  0xef   : > { %266 = vadd.xlane.f32.xlu0 %v265_v11 }
 0x17c   : > { %v267_v17 = vpop.xlane.xlu0 %266 }
 0x17d   : > { %v268_v18 = vmul.f32 0.00390625, %v267_v17 }
 0x17f   : > { %v269_v19 = vsub.f32 %v255_v5, %v268_v18  ;;  %v270_v20 = vsub.f32 %v257_v6, %v268_v18 }
 0x181   : > { %v271_v21 = vmul.f32 %v269_v19, %v269_v19  ;;  %v272_v22 = vmul.f32 %v270_v20, %v270_v20 }
 0x183   : > { %v273_v23 = vsel %vm262_vm2, %v271_v21, 0.0  ;;  %v274_v24 = vsel %vm262_vm2, %v272_v22, 0.0  ;;  %v410_v22 = vsub.s32 5, %v745_v51 }
 0x184   : > { %v275_v25 = vadd.f32 %v274_v24, %v273_v23 }
 0x186   : > { %276 = vadd.xlane.f32.xlu0 %v275_v25 }
 0x19c   : > { %361 = vperm.xlu0 %634, %v285_v12  }
 0x1a0   : > { %638 = vset.pattern.permute.xlu0 %v659_v27 }
 0x1a1   : > { %444 = vperm.xlu0 %638, %v285_v12  }
 0x1a5   : > { %639 = vset.pattern.permute.xlu0 %v660_v28 }
 0x1a6   : > { %469 = vperm.xlu0 %639, %v285_v12  }
 0x1aa   : > { %640 = vset.pattern.permute.xlu0 %v661_v29 }
 0x1ab   : > { %494 = vperm.xlu0 %640, %v285_v12  }
 0x213   : > { %v277_v30 = vpop.xlane.xlu0 %276 }
 0x214   : > { %v278_v31 = vmul.f32 0.00390625, %v277_v30  ;;  %v435_v30 = vsub.s32 6, %v745_v51 }
 0x216   : > { %v279_v32 = vadd.f32 1e-05, %v278_v31  ;;  %v440_v49 = vrot.slane %v761_v58, %v435_v30 }
 0x218   : > { %641 = vrsqrt.f32 %v279_v32 }
 0x21b   : > { %v362_v59 = vpop.permute.xlu0 %361 }
 0x220   : > { %v445_v15 = vpop.permute.xlu0 %444 }
 0x222   : > { %v642_v33 = vpop.eup %641 }
 0x223   : > { %v281_v34 = vmul.f32 %v642_v33, %v269_v19  ;;  %v282_v35 = vmul.f32 %v642_v33, %v270_v20  ;;  %v411_v33 = vrot.slane %v756_v57, %v410_v22 }
 0x225   : > { %v719_v36 = vmax.f32 %v281_v34, 0.0  ;;  %v723_v37 = vmax.f32 %v282_v35, 0.0  ;;  %v470_v34 = vpop.permute.xlu0 %469 }
 0x227   : > { %476 = vrot.lane.b32.xlu0 %v719_v36, %s662_s25  ;;  %290 = vrot.lane.b32.xlu1 %v719_v36, %s663_s26 }
 0x22b   : > { %292 = vrot.lane.b32.xlu1 %v723_v37, %s663_s26 }
 0x22f   : > { %318 = vrot.lane.b32.xlu1 %v719_v36, %s664_s27 }
 0x233   : > { %320 = vrot.lane.b32.xlu1 %v723_v37, %s664_s27 }
 0x237   : > { %343 = vrot.lane.b32.xlu1 %v719_v36, %s665_s28 }
 0x23b   : > { %345 = vrot.lane.b32.xlu1 %v723_v37, %s665_s28 }
 0x23f   : > { %368 = vrot.lane.b32.xlu1 %v719_v36, %s666_s29 }
 0x243   : > { %370 = vrot.lane.b32.xlu1 %v723_v37, %s666_s29 }
 0x247   : > { %401 = vrot.lane.b32.xlu1 %v719_v36, %s667_s30 }
 0x24b   : > { %403 = vrot.lane.b32.xlu1 %v723_v37, %s667_s30 }
 0x24f   : > { %426 = vrot.lane.b32.xlu1 %v719_v36, %s668_s5 }
 0x253   : > { %428 = vrot.lane.b32.xlu1 %v723_v37, %s668_s5 }
 0x257   : > { %451 = vrot.lane.b32.xlu1 %v719_v36, %s669_s6 }
 0x25b   : > { %453 = vrot.lane.b32.xlu1 %v723_v37, %s669_s6 }
 0x25f   : > { %478 = vrot.lane.b32.xlu1 %v723_v37, %s662_s25 }
 0x299   : > { %v291_v43 = vpop.permute.xlu1 %290 }
 0x29d   : > { %v293_v44 = vpop.permute.xlu1 %292 }
 0x29e   : > { %v297_v5 = vsel %vm296_vm4, %v291_v43, %v293_v44  ;;  %v298_v6 = vsel %vm296_vm4, %v293_v44, %v291_v43  ;;  %v415_v44 = vrot.slane %v761_v58, %v410_v22 }
 0x29f   : > { %v307_v16 = vmul.f32 %v302_v2, %v298_v6  ;;  %v308_v17 = vmul.f32 %v306_v3, %v297_v5 }
 0x2a1   : > { %v319_v45 = vpop.permute.xlu1 %318  ;;  %v314_v28 = vmul.f32 %v312_v38, %v307_v16  ;;  %v315_v29 = vmul.f32 %v312_v38, %v308_v17 }
 0x2a5   : > { %v321_v46 = vpop.permute.xlu1 %320 }
 0x2a6   : > { %v323_v63 = vsel %vm322_vm3, %v319_v45, %v321_v46  ;;  %v324_v0 = vsel %vm322_vm3, %v321_v46, %v319_v45 }
 0x2a7   : > { %v333_v8 = vmul.f32 %v328_v60, %v324_v0  ;;  %v334_v9 = vmul.f32 %v332_v61, %v323_v63 }
 0x2a9   : > { %v344_v47 = vpop.permute.xlu1 %343  ;;  %v339_v23 = vmul.f32 %v337_v39, %v333_v8  ;;  %v340_v24 = vmul.f32 %v337_v39, %v334_v9 }
 0x2ab   : > { %v341_v35 = vadd.f32 %v339_v23, %v314_v28  ;;  %v342_v43 = vadd.f32 %v340_v24, %v315_v29 }
 0x2ad   : > { %v346_v48 = vpop.permute.xlu1 %345 }
 0x2ae   : > { %v348_v10 = vsel %vm347_vm5, %v344_v47, %v346_v48  ;;  %v349_v11 = vsel %vm347_vm5, %v346_v48, %v344_v47  ;;  %v436_v48 = vrot.slane %v756_v57, %v435_v30 }
 0x2af   : > { %v358_v20 = vmul.f32 %v353_v4, %v349_v11  ;;  %v359_v21 = vmul.f32 %v357_v7, %v348_v10  ;;  %v398_v4 = vmul.f32 %v741_v41, %v723_v37 }
 0x2b1   : > { %v369_v50 = vpop.permute.xlu1 %368  ;;  %v364_v31 = vmul.f32 %v362_v59, %v358_v20  ;;  %v365_v32 = vmul.f32 %v362_v59, %v359_v21 }
 0x2b3   : > { %v366_v53 = vadd.f32 %v364_v31, %v341_v35 }
 0x2b5   : > { %v371_v54 = vpop.permute.xlu1 %370 }
 0x2b6   : > { %v373_v18 = vsel %vm372_vm6, %v369_v50, %v371_v54  ;;  %v374_v19 = vsel %vm372_vm6, %v371_v54, %v369_v50  ;;  %v460_v50 = vsub.s32 7, %v745_v51  ;;  %v367_v54 = vadd.f32 %v365_v32, %v342_v43 }
 0x2b7   : > { %v383_v26 = vmul.f32 %v378_v13, %v374_v19  ;;  %v384_v27 = vmul.f32 %v382_v14, %v373_v18  ;;  %v397_v51 = vmul.f32 %v741_v41, %v719_v36  ;;  %v601_v14 = vld [vmem:[%s820_s3 + $0x10] ss:$0 sm:$0xff]  ;;  %v602_v41 = vld [vmem:[%s820_s3 + $0x18] ss:$0 sm:$0xff] }
 0x2b8   : > { %v461_v2 = vrot.slane %v756_v57, %v460_v50  ;;  %v465_v3 = vrot.slane %v761_v58, %v460_v50 }
 0x2b9   : > { %v402_v62 = vpop.permute.xlu1 %401  ;;  %v389_v45 = vmul.f32 %v739_v40, %v383_v26  ;;  %v390_v38 = vmul.f32 %v739_v40, %v384_v27  ;;  %v495_v40 = vpop.permute.xlu0 %494 }
 0x2bb   : > { %v391_v63 = vadd.f32 %v389_v45, %v366_v53  ;;  %v392_v0 = vadd.f32 %v390_v38, %v367_v54 }
 0x2bd   : > { %v404_v12 = vpop.permute.xlu1 %403  ;;  %v399_v8 = vadd.f32 %v397_v51, %v391_v63  ;;  %v400_v9 = vadd.f32 %v398_v4, %v392_v0 }
 0x2be   : > { %v406_v46 = vsel %vm405_vm7, %v402_v62, %v404_v12  ;;  %v407_v47 = vsel %vm405_vm7, %v404_v12, %v402_v62 }
 0x2bf   : > { %v416_v59 = vmul.f32 %v411_v33, %v406_v46  ;;  %v417_v60 = vmul.f32 %v415_v44, %v407_v47 }
 0x2c1   : > { %v427_v25 = vpop.permute.xlu1 %426  ;;  %v422_v5 = vmul.f32 %v743_v42, %v416_v59  ;;  %v423_v6 = vmul.f32 %v743_v42, %v417_v60  ;;  %v477_v42 = vpop.permute.xlu0 %476 }
 0x2c3   : > { %v424_v16 = vadd.f32 %v422_v5, %v399_v8  ;;  %v425_v17 = vadd.f32 %v423_v6, %v400_v9 }
 0x2c5   : > { %v429_v39 = vpop.permute.xlu1 %428 }
 0x2c6   : > { %v431_v55 = vsel %vm430_vm8, %v427_v25, %v429_v39  ;;  %v432_v56 = vsel %vm430_vm8, %v429_v39, %v427_v25 }
 0x2c7   : > { %v441_v1 = vmul.f32 %v436_v48, %v431_v55  ;;  %v442_v62 = vmul.f32 %v440_v49, %v432_v56 }
 0x2c9   : > { %v452_v61 = vpop.permute.xlu1 %451  ;;  %v447_v57 = vmul.f32 %v445_v15, %v441_v1  ;;  %v448_v12 = vmul.f32 %v445_v15, %v442_v62 }
 0x2cb   : > { %v449_v22 = vadd.f32 %v447_v57, %v424_v16  ;;  %v450_v23 = vadd.f32 %v448_v12, %v425_v17 }
 0x2cd   : > { %v454_v7 = vpop.permute.xlu1 %453 }
 0x2ce   : > { %v456_v10 = vsel %vm455_vm9, %v452_v61, %v454_v7  ;;  %v457_v11 = vsel %vm455_vm9, %v454_v7, %v452_v61 }
 0x2cf   : > { %v466_v58 = vmul.f32 %v461_v2, %v456_v10  ;;  %v467_v13 = vmul.f32 %v465_v3, %v457_v11 }
 0x2d1   : > { %v472_v18 = vmul.f32 %v470_v34, %v466_v58  ;;  %v473_v19 = vmul.f32 %v470_v34, %v467_v13  ;;  %v479_v20 = vpop.permute.xlu1 %478 }
 0x2d2   : > { %v481_v21 = vsel %vm480_vm10, %v477_v42, %v479_v20  ;;  %v482_v15 = vsel %vm480_vm10, %v479_v20, %v477_v42 }
 0x2d3   : > { %v491_v24 = vmul.f32 %v601_v14, %v481_v21  ;;  %v492_v25 = vmul.f32 %v602_v41, %v482_v15  ;;  %v474_v28 = vadd.f32 %v472_v18, %v449_v22  ;;  %v475_v29 = vadd.f32 %v473_v19, %v450_v23 }
 0x2d5   : > { %v497_v26 = vmul.f32 %v495_v40, %v491_v24  ;;  %v498_v27 = vmul.f32 %v495_v40, %v492_v25 }
 0x2d7   : > { %v499_v30 = vadd.f32 %v497_v26, %v474_v28  ;;  %v500_v31 = vadd.f32 %v498_v27, %v475_v29 }
 0x2d9   : > { %v502_v32 = vsel %vm501_vm11, %v499_v30, 0.0  ;;  %v503_v33 = vsel %vm501_vm11, %v500_v31, 0.0 }
 0x2da   : > { %v504_v34 = vadd.f32 %v503_v33, %v502_v32 }
 0x2dc   : > { %505 = vadd.xlane.f32.xlu0 %v504_v34 }
 0x369   : > { %v506_v35 = vpop.xlane.xlu0 %505 }
 0x36a   : > { %v507_v43 = vmul.f32 0.00390625, %v506_v35 }
 0x36c   : > { %v508_v52 = vsub.f32 %v499_v30, %v507_v43  ;;  %v509_v44 = vsub.f32 %v500_v31, %v507_v43 }
 0x36e   : > { %v510_v39 = vmul.f32 %v508_v52, %v508_v52  ;;  %v511_v45 = vmul.f32 %v509_v44, %v509_v44 }
 0x370   : > { %v512_v38 = vsel %vm501_vm11, %v510_v39, 0.0  ;;  %v513_v46 = vsel %vm501_vm11, %v511_v45, 0.0 }
 0x371   : > { %v514_v47 = vadd.f32 %v513_v46, %v512_v38 }
 0x373   : > { %515 = vadd.xlane.f32.xlu1 %v514_v47 }
 0x400   : > { %v516_v48 = vpop.xlane.xlu1 %515 }
 0x401   : > { %v517_v49 = vmul.f32 0.00390625, %v516_v48 }
 0x403   : > { %v518_v50 = vadd.f32 1e-05, %v517_v49 }
 0x405   : > { %643 = vrsqrt.f32 %v518_v50 }
 0x40f   : > { %v644_v53 = vpop.eup %643 }
 0x410   : > { %v520_v54 = vmul.f32 %v644_v53, %v508_v52  ;;  %v521_v55 = vmul.f32 %v644_v53, %v509_v44 }
 0x412   : > { %v522_v56 = vmax.f32 %v520_v54, 0.0  ;;  %v523_v59 = vmax.f32 %v521_v55, 0.0 }
 0x414   : > { %v526_v60 = vrot.slane %v522_v56, 4  ;;  %v527_v61 = vrot.slane %v523_v59, 4 }
 0x416   : > { %v530_v63 = vsel %vm262_vm2, %v719_v36, %v526_v60  ;;  %v531_v0 = vsel %vm262_vm2, %v723_v37, %v527_v61 }
 0x417   : > { %532 = vst [vmem:[%s197_s20] sm:$0x7f] %v530_v63  ;;  %533 = vst [vmem:[%s197_s20 + $0x8] sm:$0x7f] %v531_v0 }
 0x418 PF: > { %s14_s15 = sadd.s32 1, %s651_s15  }
 0x419   : > { %p11_p4 = scmp.ge.s32.totalorder %s14_s15, 4  }
 0x41b   :  { %13 = sbr.rel (!%p11_p4) target bundleno = 1 (0x1), region = 66 }

</bundles_post_ra>
